<compile_context>
chip_gen: v7x
topology: tpu7x:2x2x1
jax: 0.10.0
libtpu: 0.0.40
codegen_flags: <defaults>
</compile_context>

<pallas_src>
import functools

import jax
import jax.numpy as jnp
from jax.experimental import pallas as pl
from jax.experimental.pallas import tpu as pltpu

_EPS = 1e-5          # nn.BatchNorm1d default eps
_LEAKY_SLOPE = 0.1   # nn.LeakyReLU(negative_slope=0.1)


def _round_up(v, m):
    return ((v + m - 1) // m) * m


# --------------------------------------------------------------------------------------
# Pass 0: accumulate global BatchNorm statistics (sum, sum of squares) of the pre-BN conv
# output of both branches.  Grid (N, num_row_tiles); accumulator output stays resident.
# --------------------------------------------------------------------------------------
def _stats_kernel(skip, tile_rows, n_taps, l_out, skip_row_off,
                  x_ref, w_ref, wds_ref, acc_ref):
    n = pl.program_id(0)
    j = pl.program_id(1)

    @pl.when((n == 0) & (j == 0))
    def _init():
        acc_ref[...] = jnp.zeros_like(acc_ref)

    row0 = pl.multiple_of(j * tile_rows, tile_rows)
    c_pad = acc_ref.shape[-1]

    # conv as Q unit-shift dots on the polyphase-regrouped input (no strided loads needed)
    conv = jnp.zeros((tile_rows, c_pad), jnp.float32)
    for q in range(n_taps):                       # n_taps = ceil(K / stride), unrolled
        conv = conv + jnp.dot(x_ref[pl.ds(row0 + q, tile_rows), :], w_ref[q],
                              preferred_element_type=jnp.float32)

    # mask padded rows beyond the true L_out so statistics stay exact
    valid = (row0 + jax.lax.broadcasted_iota(jnp.int32, (tile_rows, 1), 0)) < l_out
    conv = jnp.where(valid, conv, 0.0)

    rows = [jnp.sum(conv, axis=0, keepdims=True),
            jnp.sum(conv * conv, axis=0, keepdims=True)]
    if skip:
        z = jnp.dot(x_ref[pl.ds(row0 + skip_row_off, tile_rows), :], wds_ref[...],
                    preferred_element_type=jnp.float32)
        z = jnp.where(valid, z, 0.0)
        rows += [jnp.sum(z, axis=0, keepdims=True),
                 jnp.sum(z * z, axis=0, keepdims=True)]
    else:
        rows += [jnp.zeros((2, c_pad), jnp.float32)]
    acc_ref[...] += jnp.concatenate(rows, axis=0)


# --------------------------------------------------------------------------------------
# Pass 1: recompute the tiny matmul per tile and apply folded BN scale/shift, LeakyReLU,
# skip branch (1x1 strided conv + BN), final ReLU.  Lane-dense (tile_rows, C_pad) stores.
# --------------------------------------------------------------------------------------
def _apply_kernel(skip, tile_rows, n_taps, skip_row_off,
                  x_ref, w_ref, wds_ref, aff_ref, o_ref):
    j = pl.program_id(1)
    row0 = pl.multiple_of(j * tile_rows, tile_rows)
    c_pad = o_ref.shape[-1]

    conv = jnp.zeros((tile_rows, c_pad), jnp.float32)
    for q in range(n_taps):
        conv = conv + jnp.dot(x_ref[pl.ds(row0 + q, tile_rows), :], w_ref[q],
                              preferred_element_type=jnp.float32)

    y = conv * aff_ref[0:1, :] + aff_ref[1:2, :]          # BN1 (scale/shift folded in wrapper)
    y = jnp.where(y > 0, y, _LEAKY_SLOPE * y)             # LeakyReLU(0.1)

    if skip:
        z = jnp.dot(x_ref[pl.ds(row0 + skip_row_off, tile_rows), :], wds_ref[...],
                    preferred_element_type=jnp.float32)
        y = y + (z * aff_ref[2:3, :] + aff_ref[3:4, :])   # BN2 of the downsample branch

    o_ref[...] = jnp.maximum(y, 0.0).astype(o_ref.dtype)  # final ReLU


# --------------------------------------------------------------------------------------
# Wrapper: PyTorch NCL in / NCL out.
# --------------------------------------------------------------------------------------
def conv1d_block_forward(x, params, *, kernel_size, stride, skip_connection,
                         block_rows=512, compute_dtype=jnp.float32):
    """x: (N, C_in, L) float32.  Returns (N, C_out, L_out), matching the PyTorch module
    in training mode (BatchNorm uses batch statistics)."""
    N, C_in, L = x.shape
    K, s = int(kernel_size), int(stride)
    pad = K // 2
    C_out = params["w1"].shape[0]
    if skip_connection and K % 2 == 0:
        raise ValueError("skip_connection requires odd kernel_size (PyTorch module assumption).")

    L_pad = L + 2 * pad
    L_out = (L_pad - K) // s + 1
    Q = -(-K // s)                       # taps after polyphase regrouping
    SC = s * C_in                        # channels of the regrouped input
    C_pad = _round_up(C_out, 128)        # lane-dense output channels

    # ---- tile sizing along output positions (rows) ----
    TL = min(_round_up(block_rows, 8), _round_up(L_out, 8))
    num_tiles = -(-L_out // TL)
    L_out_p = num_tiles * TL
    L_rows = L_out_p + Q - 1             # polyphase rows the kernel may touch

    # ---- glue: NCL -> NLC, replicate pad, polyphase regroup (reads x once; no K x im2col) ----
    x_nlc = jnp.transpose(x, (0, 2, 1)).astype(compute_dtype)           # (N, L, C_in)
    x_p = jnp.pad(x_nlc, ((0, 0), (pad, pad), (0, 0)), mode="edge")     # padding_mode='replicate'
    T_len = L_rows * s
    if T_len > L_pad:
        x_p = jnp.pad(x_p, ((0, 0), (0, T_len - L_pad), (0, 0)))        # zero tail (never used by valid taps)
    else:
        x_p = x_p[:, :T_len, :]
    x_poly = x_p.reshape(N, L_rows, SC)                                 # (N, L_rows, s*C_in)

    # ---- conv weights regrouped to Q unit-shift taps over s*C_in channels ----
    w_taps = jnp.transpose(params["w1"], (2, 1, 0))                     # (K, C_in, C_out)
    w_taps = jnp.pad(w_taps, ((0, Q * s - K), (0, 0), (0, C_pad - C_out)))
    w_poly = w_taps.reshape(Q, SC, C_pad).astype(compute_dtype)

    # downsample (1x1, stride s) input position p*s lives at x_poly[:, p + skip_a, skip_b*C_in:...];
    # embed its weight in an (SC, C_pad) matrix so the kernel needs no narrow lane slice.
    skip_a, skip_b = divmod(pad, s)
    wds_sc = jnp.zeros((SC, C_pad), compute_dtype)
    if skip_connection:
        wds_t = jnp.transpose(params["w_ds"][:, :, 0], (1, 0))          # (C_in, C_out)
        wds_sc = wds_sc.at[skip_b * C_in:(skip_b + 1) * C_in, :C_out].set(
            wds_t.astype(compute_dtype))

    # grid-invariant / per-batch-resident BlockSpecs (fetched once, not per tile)
    x_spec = pl.BlockSpec((None, L_rows, SC), lambda n, j: (n, 0, 0))
    w_spec = pl.BlockSpec((Q, SC, C_pad), lambda n, j: (0, 0, 0))
    wds_spec = pl.BlockSpec((SC, C_pad), lambda n, j: (0, 0))
    vmem_limit = 64 * 1024 * 1024

    # ---- pass 0: global BN statistics ----
    stats = pl.pallas_call(
        functools.partial(_stats_kernel, skip_connection, TL, Q, L_out, skip_a),
        out_shape=jax.ShapeDtypeStruct((4, C_pad), jnp.float32),
        grid=(N, num_tiles),
        in_specs=[x_spec, w_spec, wds_spec],
        out_specs=pl.BlockSpec((4, C_pad), lambda n, j: (0, 0)),
        compiler_params=pltpu.CompilerParams(
            dimension_semantics=("arbitrary", "arbitrary"),
            vmem_limit_bytes=vmem_limit),
    )(x_poly, w_poly, wds_sc)

    # ---- tiny inter-pass math: fold batch stats + gamma/beta into per-channel scale/shift.
    # Note: with batch-statistics BN the conv bias b1 cancels exactly, so it is not needed.
    M = N * L_out
    g1 = jnp.pad(params["bn1_gamma"].astype(jnp.float32), (0, C_pad - C_out))
    b1 = jnp.pad(params["bn1_beta"].astype(jnp.float32), (0, C_pad - C_out))
    mean1 = stats[0] / M
    var1 = jnp.maximum(stats[1] / M - mean1 * mean1, 0.0)
    scale1 = g1 * jax.lax.rsqrt(var1 + _EPS)
    shift1 = b1 - scale1 * mean1
    if skip_connection:
        g2 = jnp.pad(params["bn2_gamma"].astype(jnp.float32), (0, C_pad - C_out))
        b2 = jnp.pad(params["bn2_beta"].astype(jnp.float32), (0, C_pad - C_out))
        mean2 = stats[2] / M
        var2 = jnp.maximum(stats[3] / M - mean2 * mean2, 0.0)
        scale2 = g2 * jax.lax.rsqrt(var2 + _EPS)
        shift2 = b2 - scale2 * mean2
    else:
        scale2 = jnp.zeros((C_pad,), jnp.float32)
        shift2 = jnp.zeros((C_pad,), jnp.float32)
    aff = jnp.stack([scale1, shift1, scale2, shift2], axis=0)           # (4, C_pad)

    # ---- pass 1: normalize + activations, lane-dense tiled output ----
    out = pl.pallas_call(
        functools.partial(_apply_kernel, skip_connection, TL, Q, skip_a),
        out_shape=jax.ShapeDtypeStruct((N, L_out_p, C_pad), jnp.float32),
        grid=(N, num_tiles),
        in_specs=[x_spec, w_spec, wds_spec,
                  pl.BlockSpec((4, C_pad), lambda n, j: (0, 0))],
        out_specs=pl.BlockSpec((None, TL, C_pad), lambda n, j: (n, j, 0)),
        compiler_params=pltpu.CompilerParams(
            dimension_semantics=("parallel", "parallel"),
            vmem_limit_bytes=vmem_limit),
    )(x_poly, w_poly, wds_sc, aff)

    # NCL output for parity with the PyTorch module (skip this transpose if the consumer
    # can take NLC / lane-dense channels directly).
    return jnp.transpose(out[:, :L_out, :C_out], (0, 2, 1))


# --------------------------------------------------------------------------------------
# Pure-JAX reference mirroring the PyTorch module (direct conv, NCL layout).
# --------------------------------------------------------------------------------------
def _ref_forward(x, params, *, kernel_size, stride, skip_connection):
    N, C_in, L = x.shape
    K, pad = kernel_size, kernel_size // 2
    x_pad = jnp.pad(x, ((0, 0), (0, 0), (pad, pad)), mode="edge")
    L_out = (L + 2 * pad - K) // stride + 1
    starts = jnp.arange(L_out) * stride
    windows = jnp.stack([x_pad[:, :, starts + k] for k in range(K)], axis=-1)  # (N,Cin,Lout,K)
    y = jnp.einsum("nclk,ock->nol", windows, params["w1"]) + params["b1"][None, :, None]
    mu = jnp.mean(y, axis=(0, 2), keepdims=True)
    var = jnp.mean((y - mu) ** 2, axis=(0, 2), keepdims=True)
    y = (y - mu) * jax.lax.rsqrt(var + _EPS)
    y = y * params["bn1_gamma"][None, :, None] + params["bn1_beta"][None, :, None]
    y = jnp.where(y > 0, y, _LEAKY_SLOPE * y)
    if skip_connection:
        z = jnp.einsum("ncl,oc->nol", x[:, :, starts], params["w_ds"][:, :, 0])
        mu2 = jnp.mean(z, axis=(0, 2), keepdims=True)
        var2 = jnp.mean((z - mu2) ** 2, axis=(0, 2), keepdims=True)
        z = (z - mu2) * jax.lax.rsqrt(var2 + _EPS)
        z = z * params["bn2_gamma"][None, :, None] + params["bn2_beta"][None, :, None]
        y = y + z
    return jnp.maximum(y, 0.0)


if __name__ == "__main__":
    def _run_case(key, N, C_in, C_out, L, K, stride, skip):
        ks = jax.random.split(key, 8)
        x = jax.random.normal(ks[0], (N, C_in, L), jnp.float32)
        params = {
            "w1": 0.1 * jax.random.normal(ks[1], (C_out, C_in, K), jnp.float32),
            "b1": 0.1 * jax.random.normal(ks[2], (C_out,), jnp.float32),
            "bn1_gamma": 1.0 + 0.1 * jax.random.normal(ks[3], (C_out,), jnp.float32),
            "bn1_beta": 0.1 * jax.random.normal(ks[4], (C_out,), jnp.float32),
            "w_ds": 0.1 * jax.random.normal(ks[5], (C_out, C_in, 1), jnp.float32),
            "bn2_gamma": 1.0 + 0.1 * jax.random.normal(ks[6], (C_out,), jnp.float32),
            "bn2_beta": 0.1 * jax.random.normal(ks[7], (C_out,), jnp.float32),
        }
        y = conv1d_block_forward(x, params, kernel_size=K, stride=stride,
                                 skip_connection=skip)
        y = jax.block_until_ready(y)
        L_out = (L + 2 * (K // 2) - K) // stride + 1
        assert y.shape == (N, C_out, L_out), (y.shape, (N, C_out, L_out))
        y_ref = _ref_forward(x, params, kernel_size=K, stride=stride,
                             skip_connection=skip)
        assert bool(jnp.allclose(y, y_ref, atol=5e-4, rtol=5e-4)), \
            f"mismatch vs reference (K={K}, stride={stride}, skip={skip})"

    key = jax.random.PRNGKey(0)
    k1, k2, k3 = jax.random.split(key, 3)
    _run_case(k1, 2, 4, 8, 16, 3, 2, True)    # original toy config, with skip
    _run_case(k2, 2, 4, 8, 19, 5, 3, True)    # non-divisible L_out (tile masking), stride 3
    _run_case(k3, 2, 4, 8, 16, 3, 1, False)   # stride 1, no skip branch
    print("KERNEL_OK")
</pallas_src>

<mosaic_0001>
module attributes {stable_mosaic.version = 11 : i64} {
  func.func @_stats_kernel(%arg0: i32, %arg1: i32, %arg2: memref<1x9x8xf32, #tpu.memory_space<vmem>>, %arg3: memref<2x8x128xf32, #tpu.memory_space<vmem>>, %arg4: memref<8x128xf32, #tpu.memory_space<vmem>>, %arg5: memref<4x128xf32, #tpu.memory_space<vmem>>) attributes {dimension_semantics = [#tpu.dimension_semantics<arbitrary>, #tpu.dimension_semantics<arbitrary>], iteration_bounds = array<i64: 2, 1>, scalar_prefetch = 0 : i64, scratch_operands = 0 : i64, tpu.core_type = #tpu.core_type<tc>, window_params = [{transform_indices = @transform_0, window_bounds = array<i64: 1, 9, 8>}, {pipeline_mode = #tpu.pipeline_mode<synchronous>, transform_indices = @transform_1, window_bounds = array<i64: 2, 8, 128>}, {pipeline_mode = #tpu.pipeline_mode<synchronous>, transform_indices = @transform_2, window_bounds = array<i64: 8, 128>}, {pipeline_mode = #tpu.pipeline_mode<synchronous>, transform_indices = @transform_3, window_bounds = array<i64: 4, 128>}]} {
    %c0_i32 = arith.constant 0 : i32
    %0 = arith.cmpi eq, %arg0, %c0_i32 : i32
    %c0_i32_0 = arith.constant 0 : i32
    %1 = arith.cmpi eq, %arg1, %c0_i32_0 : i32
    %2 = arith.andi %0, %1 : i1
    %3 = arith.extui %2 : i1 to i32
    %c0_i32_1 = arith.constant 0 : i32
    %4 = arith.cmpi ne, %3, %c0_i32_1 : i32
    scf.if %4 {
      %cst_30 = arith.constant 0.000000e+00 : f32
      %57 = vector.broadcast %cst_30 : f32 to vector<4x128xf32>
      %c0_31 = arith.constant 0 : index
      %c0_32 = arith.constant 0 : index
      %58 = vector.load %arg5[%c0_31, %c0_32] : memref<4x128xf32, #tpu.memory_space<vmem>>, vector<4x128xf32>
      tpu.vector_store %arg5[%c0_31, %c0_32], %57 {strides = array<i32>} : memref<4x128xf32, #tpu.memory_space<vmem>>, vector<4x128xf32>,
    } else {
    }
    %c8_i32 = arith.constant 8 : i32
    %5 = arith.muli %arg1, %c8_i32 : i32
    %6 = tpu.assume_multiple %5, 8 : i32
    %cst = arith.constant 0.000000e+00 : f32
    %7 = vector.broadcast %cst : f32 to vector<8x128xf32>
    %c0_i32_2 = arith.constant 0 : i32
    %8 = arith.addi %6, %c0_i32_2 : i32
    %c0 = arith.constant 0 : index
    %9 = arith.index_cast %8 : i32 to index
    %c0_3 = arith.constant 0 : index
    %10 = vector.load %arg2[%c0, %9, %c0_3] : memref<1x9x8xf32, #tpu.memory_space<vmem>>, vector<1x8x8xf32>
    %11 = vector.shape_cast %10 : vector<1x8x8xf32> to vector<8x8xf32>
    %c0_4 = arith.constant 0 : index
    %c0_5 = arith.constant 0 : index
    %c0_6 = arith.constant 0 : index
    %12 = vector.load %arg3[%c0_4, %c0_5, %c0_6] : memref<2x8x128xf32, #tpu.memory_space<vmem>>, vector<1x8x128xf32>
    %13 = vector.shape_cast %12 : vector<1x8x128xf32> to vector<8x128xf32>
    %cst_7 = arith.constant dense<0.000000e+00> : vector<8x128xf32>
    %14 = tpu.matmul %11, %13, %cst_7 {dimension_numbers = #tpu.dot_dimension_numbers<[1], [0], [0], [1], [0, 0, 1, 1], [], []>} : vector<8x8xf32>, vector<8x128xf32>, vector<8x128xf32> -> vector<8x128xf32>
    %15 = arith.addf %7, %14 : vector<8x128xf32>
    %c1_i32 = arith.constant 1 : i32
    %16 = arith.addi %6, %c1_i32 : i32
    %c0_8 = arith.constant 0 : index
    %17 = arith.index_cast %16 : i32 to index
    %c0_9 = arith.constant 0 : index
    %18 = vector.load %arg2[%c0_8, %17, %c0_9] : memref<1x9x8xf32, #tpu.memory_space<vmem>>, vector<1x8x8xf32>
    %19 = vector.shape_cast %18 : vector<1x8x8xf32> to vector<8x8xf32>
    %c1 = arith.constant 1 : index
    %c0_10 = arith.constant 0 : index
    %c0_11 = arith.constant 0 : index
    %20 = vector.load %arg3[%c1, %c0_10, %c0_11] : memref<2x8x128xf32, #tpu.memory_space<vmem>>, vector<1x8x128xf32>
    %21 = vector.shape_cast %20 : vector<1x8x128xf32> to vector<8x128xf32>
    %cst_12 = arith.constant dense<0.000000e+00> : vector<8x128xf32>
    %22 = tpu.matmul %19, %21, %cst_12 {dimension_numbers = #tpu.dot_dimension_numbers<[1], [0], [0], [1], [0, 0, 1, 1], [], []>} : vector<8x8xf32>, vector<8x128xf32>, vector<8x128xf32> -> vector<8x128xf32>
    %23 = arith.addf %15, %22 : vector<8x128xf32>
    %24 = tpu.iota {dimensions = array<i32: 0>} : vector<8x1xi32>
    %25 = vector.broadcast %6 : i32 to vector<8x1xi32>
    %26 = arith.addi %25, %24 : vector<8x1xi32>
    %c8_i32_13 = arith.constant 8 : i32
    %27 = vector.broadcast %c8_i32_13 : i32 to vector<8x1xi32>
    %28 = arith.cmpi slt, %26, %27 : vector<8x1xi32>
    %cst_14 = arith.constant 0.000000e+00 : f32
    %29 = vector.shape_cast %28 : vector<8x1xi1> to vector<8x1xi1>
    %30 = vector.broadcast %29 : vector<8x1xi1> to vector<8x128xi1>
    %31 = vector.broadcast %cst_14 : f32 to vector<8x128xf32>
    %32 = arith.select %30, %23, %31 : vector<8x128xi1>, vector<8x128xf32>
    %cst_15 = arith.constant dense<0.000000e+00> : vector<128xf32>
    %33 = vector.multi_reduction <add>, %32, %cst_15 [0] : vector<8x128xf32> to vector<128xf32>
    %34 = vector.shape_cast %33 : vector<128xf32> to vector<1x128xf32>
    %35 = arith.mulf %32, %32 : vector<8x128xf32>
    %cst_16 = arith.constant dense<0.000000e+00> : vector<128xf32>
    %36 = vector.multi_reduction <add>, %35, %cst_16 [0] : vector<8x128xf32> to vector<128xf32>
    %37 = vector.shape_cast %36 : vector<128xf32> to vector<1x128xf32>
    %c0_i32_17 = arith.constant 0 : i32
    %38 = arith.addi %6, %c0_i32_17 : i32
    %c0_18 = arith.constant 0 : index
    %39 = arith.index_cast %38 : i32 to index
    %c0_19 = arith.constant 0 : index
    %40 = vector.load %arg2[%c0_18, %39, %c0_19] : memref<1x9x8xf32, #tpu.memory_space<vmem>>, vector<1x8x8xf32>
    %41 = vector.shape_cast %40 : vector<1x8x8xf32> to vector<8x8xf32>
    %c0_20 = arith.constant 0 : index
    %c0_21 = arith.constant 0 : index
    %42 = vector.load %arg4[%c0_20, %c0_21] : memref<8x128xf32, #tpu.memory_space<vmem>>, vector<8x128xf32>
    %cst_22 = arith.constant dense<0.000000e+00> : vector<8x128xf32>
    %43 = tpu.matmul %41, %42, %cst_22 {dimension_numbers = #tpu.dot_dimension_numbers<[1], [0], [0], [1], [0, 0, 1, 1], [], []>} : vector<8x8xf32>, vector<8x128xf32>, vector<8x128xf32> -> vector<8x128xf32>
    %cst_23 = arith.constant 0.000000e+00 : f32
    %44 = vector.shape_cast %28 : vector<8x1xi1> to vector<8x1xi1>
    %45 = vector.broadcast %44 : vector<8x1xi1> to vector<8x128xi1>
    %46 = vector.broadcast %cst_23 : f32 to vector<8x128xf32>
    %47 = arith.select %45, %43, %46 : vector<8x128xi1>, vector<8x128xf32>
    %cst_24 = arith.constant dense<0.000000e+00> : vector<128xf32>
    %48 = vector.multi_reduction <add>, %47, %cst_24 [0] : vector<8x128xf32> to vector<128xf32>
    %49 = vector.shape_cast %48 : vector<128xf32> to vector<1x128xf32>
    %50 = arith.mulf %47, %47 : vector<8x128xf32>
    %cst_25 = arith.constant dense<0.000000e+00> : vector<128xf32>
    %51 = vector.multi_reduction <add>, %50, %cst_25 [0] : vector<8x128xf32> to vector<128xf32>
    %52 = vector.shape_cast %51 : vector<128xf32> to vector<1x128xf32>
    %c0_26 = arith.constant 0 : index
    %c0_27 = arith.constant 0 : index
    %53 = vector.load %arg5[%c0_26, %c0_27] : memref<4x128xf32, #tpu.memory_space<vmem>>, vector<4x128xf32>
    %54 = tpu.concatenate %34, %37, %49, %52 in 0 : vector<1x128xf32>, vector<1x128xf32>, vector<1x128xf32>, vector<1x128xf32> -> vector<4x128xf32>
    %55 = arith.addf %53, %54 : vector<4x128xf32>
    %c0_28 = arith.constant 0 : index
    %c0_29 = arith.constant 0 : index
    %56 = vector.load %arg5[%c0_28, %c0_29] : memref<4x128xf32, #tpu.memory_space<vmem>>, vector<4x128xf32>
    tpu.vector_store %arg5[%c0_28, %c0_29], %55 {strides = array<i32>} : memref<4x128xf32, #tpu.memory_space<vmem>>, vector<4x128xf32>,
    return
  }
  func.func @transform_0(%arg0: i32, %arg1: i32) -> (i32, i32, i32) {
    %c0_i32 = arith.constant 0 : i32
    %c0_i32_0 = arith.constant 0 : i32
    %c0_i32_1 = arith.constant 0 : i32
    return %arg0, %c0_i32, %c0_i32_0 : i32, i32, i32
  }
  func.func @transform_1(%arg0: i32, %arg1: i32) -> (i32, i32, i32) {
    %c0_i32 = arith.constant 0 : i32
    %c0_i32_0 = arith.constant 0 : i32
    %c0_i32_1 = arith.constant 0 : i32
    %c0_i32_2 = arith.constant 0 : i32
    return %c0_i32, %c0_i32_0, %c0_i32_1 : i32, i32, i32
  }
  func.func @transform_2(%arg0: i32, %arg1: i32) -> (i32, i32) {
    %c0_i32 = arith.constant 0 : i32
    %c0_i32_0 = arith.constant 0 : i32
    %c0_i32_1 = arith.constant 0 : i32
    return %c0_i32, %c0_i32_0 : i32, i32
  }
  func.func @transform_3(%arg0: i32, %arg1: i32) -> (i32, i32) {
    %c0_i32 = arith.constant 0 : i32
    %c0_i32_0 = arith.constant 0 : i32
    %c0_i32_1 = arith.constant 0 : i32
    return %c0_i32, %c0_i32_0 : i32, i32
  }
}

</mosaic_0001>

<bundles_post_ra>
// kernel: tpu_custom_call.1
= control target key start
LH: loop header
LB: loop body
LE: loop exit
PB: predicated region body
PF: predicated region fallthrough
CT: control target
= control target key end

     0   :  { %8 = vsyncpa [#allocation3], 0  ;;  %s1147_s0 = inlined_call_operand.hbm [shape: f32[2,9,8], index: 0, kind: input, shape index: {}]   ;;  %s1148_s1 = inlined_call_operand.hbm [shape: f32[2,8,128], index: 1, kind: input, shape index: {}]   ;;  %s1149_s2 = inlined_call_operand.hbm [shape: f32[8,128], index: 2, kind: input, shape index: {}]   ;;  %s1150_s3 = inlined_call_operand.hbm [shape: f32[4,128], index: 3, kind: output, shape index: {}]  }
   0x1   :  { %10 = vsyncpa [#allocation3 + $0x1], 0 }
   0x2   :  { %11 = vsyncpa [#allocation6], 0 }
   0x3   :  { %12 = vsyncpa [#allocation4], 0  ;;  %s919_s12 = smov 0   ;;  %s921_s13 = smov 0  }
   0x4   :  { %s923_s14 = smov 0   ;;  %s925_s15 = smov 0  }
   0x5   :  { %s927_s16 = smov 0   ;;  %s929_s17 = smov 0  }
   0x6 LB: > { %s584_s18 = sadd.s32 4294967295, %s888_s17   ;;  %p50_p0 = scmp.ne.s32.totalorder %s872_s13, %s868_s12  ;;  %s888_s17 = sphi %s929_s17, %s18_s17   ;;  %s884_s16 = sphi %s927_s16, %s1168_s16   ;;  %s880_s15 = sphi %s925_s15, %s1167_s15   ;;  %s876_s14 = sphi %s923_s14, %s1166_s14   ;;  %s872_s13 = sphi %s921_s13, %s1165_s13   ;;  %s868_s12 = sphi %s919_s12, %s1164_s12  }
   0x7   : > { %p951_p1 = scmp.eq.s32.totalorder %s584_s18, 0  ;;  %p585_p2 = scmp.ge.s32.totalorder %s888_s17, 1 }
   0x8   : > { %p124_p3 = scmp.lt.s32.totalorder %s888_s17, 3  ;;  %s890_s22 = smov [#allocation5]  }
   0x9   : > { %s1155_s19 = scalar_select %p951_p1, 1, 0 }
   0xa   : > { %p959_p4 = por %p951_p1, %p50_p0  ;;  %p963_p5 = pnand %p585_p2, %p124_p3 }
   0xb   : > { %s136_s23 = sshll.u32 %s890_s22, 4  ;;  %s891_s25 = smov [#allocation7]   ;;  %s137_s23 = int_to_ptr.vmem [resolvable:$true] %s136_s23 }
   0xc   : > { %s1156_s20 = scalar_select %p959_p4, 1, 0 }
   0xd   : > { %s1157_s21 = scalar_select %p963_p5, 1, 0 }
   0xe   : > { %p644_p6 = pneg %p963_p5  ;;  %s150_s26 = sshll.u32 %s891_s25, 4  ;;  %s975_s26 = int_to_ptr.vmem [resolvable:$true] %s150_s26 }
   0xf   : > { %s718_s29 = scalar_lea.hbm %s1148_s1, 256 }
  0x10   : > { %p971_p7 = pnand %p644_p6, %p951_p1  ;;  %p719_p8 = scmp.ne.s32.totalorder %s1148_s1, %s718_s29 }
  0x11   : > { %p725_p12 = scmp.lt.u32.totalorder %s718_s29, %s1148_s1 }
  0x12   : > { %p720_p9 = pneg %p971_p7 }
  0x14   : > { %p721_p10 = pnand %p720_p9, %p719_p8 }
  0x16   : > { %p722_p11 = pneg %p721_p10 }
  0x18   : > { %p727_p13 = pnand %p725_p12, %p722_p11 }
  0x1a   : > { %730 = shalt.err (!%p727_p13)
}
  0x1b   : > { %s731_s7 = scalar_lea.vmem %s137_s23, 256  ;;  %p739_p6 = scmp.lt.s32.totalorder %s137_s23, %s137_s23 }
  0x1c   : > { %p732_p0 = scmp.ne.s32.totalorder %s137_s23, %s731_s7  ;;  %p740_p1 = scmp.lt.s32.totalorder %s731_s7, %s731_s7 }
  0x1e   : > { %p734_p2 = pnand %p732_p0, %p720_p9  ;;  %p741_p4 = por %p740_p1, %p739_p6 }
  0x20   : > { %p735_p3 = pneg %p734_p2 }
  0x22   : > { %p742_p5 = pnand %p741_p4, %p735_p3 }
  0x24   : > { %745 = shalt.err (!%p742_p5)
}
  0x25   : > { %s892_s8 = smov 128   ;;  %s893_s9 = smov 8  }
  0x26   : > { %647 = dma.hbm_to_vmem [thread:$0]  (!%p971_p7), %s1148_s1, 256, %s137_s23, [#allocation6], %s892_s8, %s892_s8, %s893_s9  }
  0x27   : > { %s746_s25 = scalar_lea.hbm %s1149_s2, 128 }
  0x28   : > { %p747_p1 = scmp.ne.s32.totalorder %s1149_s2, %s746_s25  ;;  %p753_p8 = scmp.lt.u32.totalorder %s746_s25, %s1149_s2 }
  0x2a   : > { %p749_p4 = pnand %p747_p1, %p720_p9 }
  0x2c   : > { %p750_p5 = pneg %p749_p4 }
  0x2e   : > { %p755_p10 = pnand %p753_p8, %p750_p5 }
  0x30   : > { %758 = shalt.err (!%p755_p10)
}
  0x31   : > { %s759_s23 = scalar_lea.vmem %s975_s26, 128  ;;  %p767_p0 = scmp.lt.s32.totalorder %s975_s26, %s975_s26 }
  0x32   : > { %p760_p11 = scmp.ne.s32.totalorder %s975_s26, %s759_s23  ;;  %p768_p2 = scmp.lt.s32.totalorder %s759_s23, %s759_s23 }
  0x34   : > { %p762_p12 = pnand %p760_p11, %p720_p9  ;;  %p769_p3 = por %p768_p2, %p767_p0 }
  0x36   : > { %p763_p13 = pneg %p762_p12 }
  0x38   : > { %p770_p6 = pnand %p769_p3, %p763_p13 }
  0x3a   : > { %773 = shalt.err (!%p770_p6)
}
  0x3b   : > { %650 = dma.hbm_to_vmem [thread:$0]  (!%p971_p7), %s1149_s2, 128, %s975_s26, [#allocation6]  }
  0x3c   : > { %s30_s6 = sadd.s32 1, %s884_s16  ;;  %s37_s7 = sadd.s32 1, %s876_s14 }
  0x3d   : > { %p32_p9 = scmp.ge.s32.totalorder %s30_s6, 2  ;;  %p44_p1 = scmp.ne.s32.totalorder %s876_s14, %s872_s13 }
  0x3e   : > { %p45_p4 = scmp.eq.s32.totalorder %s888_s17, 0  ;;  %p657_p5 = scmp.lt.s32.totalorder %s888_s17, 2 }
  0x3f   : > { %s1170_s6 = smov (%p32_p9, %s30_s6), 0  ;;  %s161_s24 = sand.u32 1, %s876_s14  }
  0x40   : > { %p46_p8 = por %p45_p4, %p44_p1  ;;  %s34_s10 = ssub.s32 %s884_s16, %s1170_s6 }
  0x41   : > { %p35_p10 = scmp.eq.s32.totalorder %s34_s10, 0  ;;  %s589_s11 = sshll.u32 %s161_s24, 4 }
  0x42   : > { %s605_s12 = sshll.u32 %s884_s16, 8  ;;  %s165_s28 = scalar_lea.vmem [#allocation2], %s589_s11 }
  0x43   : > { %s1040_s22 = scalar_select %p35_p10, %s876_s14, %s37_s7  }
  0x44   : > { %s1045_s27 = scalar_lea.hbm %s1147_s0, %s605_s12  ;;  %s172_s29 = sshll.u32 %s165_s28, 4  ;;  %s1047_s29 = int_to_ptr.vmem [resolvable:$true] %s172_s29 }
  0x45   : > { %p1051_p7 = pnand %p657_p5, %p46_p8  ;;  %s1055_s23 = scalar_lea.sflag [#allocation3], %s161_s24 }
  0x46   : > { %s774_s4 = scalar_lea.hbm %s1045_s27, 256  ;;  %s779_s10 = scalar_lea.hbm %s1147_s0, 512 }
  0x47   : > { %p775_p11 = scmp.ne.s32.totalorder %s1045_s27, %s774_s4  ;;  %p776_p12 = pneg %p1051_p7 }
  0x48   : > { %p780_p2 = scmp.lt.u32.totalorder %s1045_s27, %s1147_s0  ;;  %p781_p3 = scmp.lt.u32.totalorder %s779_s10, %s774_s4 }
  0x49   : > { %p777_p13 = pnand %p776_p12, %p775_p11  ;;  %p783_p9 = scmp.lt.u32.totalorder %s774_s4, %s1045_s27 }
  0x4a   : > { %p782_p6 = por %p781_p3, %p780_p2 }
  0x4b   : > { %p778_p0 = pneg %p777_p13 }
  0x4c   : > { %p784_p1 = por %p783_p9, %p782_p6 }
  0x4e   : > { %p785_p4 = pnand %p784_p1, %p778_p0 }
  0x50   : > { %788 = shalt.err (!%p785_p4)
}
  0x51   : > { %s789_s24 = scalar_lea.vmem %s1047_s29, 256  ;;  %s894_s25 = smov [#allocation2]  }
  0x52   : > { %p790_p5 = scmp.ne.s32.totalorder %s1047_s29, %s789_s24  ;;  %s794_s26 = sshll.u32 %s894_s25, 4  ;;  %s795_s26 = int_to_ptr.vmem [resolvable:$false] %s794_s26 }
  0x53   : > { %s796_s28 = scalar_lea.vmem %s795_s26, 512  ;;  %p797_p11 = scmp.lt.s32.totalorder %s1047_s29, %s795_s26 }
  0x54   : > { %p792_p8 = pnand %p790_p5, %p776_p12  ;;  %p798_p13 = scmp.lt.s32.totalorder %s796_s28, %s789_s24 }
  0x56   : > { %p793_p10 = pneg %p792_p8  ;;  %p799_p2 = por %p798_p13, %p797_p11 }
  0x58   : > { %p800_p3 = pnand %p799_p2, %p793_p10 }
  0x5a   : > { %803 = shalt.err (!%p800_p3)
}
  0x5b   : > { %654 = dma.hbm_to_vmem [thread:$0]  (!%p1051_p7), %s1045_s27, 256, %s1047_s29, %s1055_s23, %s892_s8, %s892_s8, %s893_s9  }
  0x5c   : > { %p1160_p12 = scmp.ne.s32.totalorder %s1157_s21, 0 }
  0x5d   : > { %s186_s4 = sand.u32 (!%p1160_p12), 1, %s872_s13   ;;  %p1161_p0 = scmp.ne.s32.totalorder (!%p1160_p12), %s1156_s20, 0 }
  0x5e   : > { %184 = sbr.rel (%p1160_p12) target bundleno = 371 (0x173), region = 32  ;;  %s593_s5 = sshll.u32 (!%p1160_p12), %s186_s4, 4 }
  0x5f   : > { %s187_s7 = scalar_lea.sflag (!%p1160_p12), [#allocation3], %s186_s4  ;;  %s190_s10 = scalar_lea.vmem (!%p1160_p12), [#allocation2], %s593_s5 }
  0x65   : > { %855 = dma.done.wait (%p1161_p0), %s187_s7, 256  }
  0x66   : > { %857 = vsyncadd (%p1161_p0), %s187_s7, 4294967040  ;;  %p1162_p6 = scmp.ne.s32.totalorder %s1155_s19, 0 }
  0x68   : > { %859 = dma.done.wait (%p1162_p6), [#allocation6], 384  }
  0x69   : > { %861 = vsyncadd (%p1162_p6), [#allocation6], 4294966912  ;;  %p216_p7 = scmp.eq.s32.totalorder %s880_s15, 0 }
  0x6a   : > { %v895_v0 = vmov (%p216_p7), 0.0  }
  0x6b   : > { %221 = sbr.rel (!%p216_p7) target bundleno = 114 (0x72), region = 48  ;;  %222 = vst [vmem:[#allocation8] sm:$0xf] (%p216_p7), %v895_v0 }
  0x72 PF: > { %v231_v1 = vld [vmem:[#allocation5 + $0x8] sm:$0xff]  ;;  %vm232_vm0 = vcmask 64512   ;;  %v896_v3 = vmov 0.0   ;;  %vm897_vm1 = vmmov 0   ;;  %v226_v4 = vld [vmem:[#allocation5] sm:$0xff]  ;;  %v400_v5 = vld [vmem:[#allocation7] sm:$0xff] }
  0x73   : > { %v597_v2 = vld [vmem:[%s190_s10 + $0x1] sm:$0xff]  ;;  %613 = vmatprep.subr.mxu0 %v896_v3  ;;  %615 = vmatprep.mubr.msk.f32.mxu0 %vm897_vm1, %v896_v3  ;;  %vm486_vm2 = vcmask 1040384   ;;  %vm488_vm3 = vcmask 1041408   ;;  %vm490_vm4 = vcmask 1042432   ;;  %s898_s15 = smov [#allocation8]   ;;  %p1103_p9 = scmp.eq.s32.totalorder %s584_s18, 1 }
  0x74   : > { %614 = vmatpush3.msra.mxu0 %v231_v1  ;;  %623 = vmatprep.subr.mxu1 %v896_v3  ;;  %v225_v6 = vld [vmem:[%s190_s10] sm:$0xff]  ;;  %v485_v37 = vld [vmem:[#allocation8] sm:$0xf]  ;;  %s501_s19 = sshll.u32 %s898_s15, 4  ;;  %s502_s19 = int_to_ptr.vmem [resolvable:$true] %s501_s19 }
  0x75   : > { %616 = vmatmul.mubr.msk.f32.vlgmr.msra.gmra.mrb[0].mxu0 %vm232_vm0, %v597_v2  ;;  %618 = vmatprep.subr.mxu0 %v896_v3  ;;  %s804_s21 = scalar_lea.vmem %s502_s19, 64  ;;  %p811_p8 = scmp.lt.s32.totalorder %s502_s19, %s502_s19 }
  0x76   : > { %619 = vmatpush3.msra.mxu0 %v226_v4  ;;  %624 = vmatpush3.msra.mxu1 %v400_v5  ;;  %p805_p1 = scmp.ne.s32.totalorder %s502_s19, %s804_s21  ;;  %p812_p10 = scmp.lt.s32.totalorder %s804_s21, %s804_s21 }
  0x77   : > { %625 = vmatprep.mubr.msk.f32.mxu1 %vm897_vm1, %v896_v3  ;;  %620 = vmatprep.mubr.msk.f32.mxu0 %vm897_vm1, %v896_v3 }
  0x78   : > { %626 = vmatmul.mubr.msk.f32.vlgmr.msra.gmra.mrb[0].mxu1 %vm232_vm0, %v225_v6  ;;  %p806_p4 = pnand %p805_p1, %p1103_p9  ;;  %p813_p11 = por %p812_p10, %p811_p8 }
  0x7a   : > { %p807_p5 = pneg %p806_p4 }
  0x7c   : > { %p814_p13 = pnand %p813_p11, %p807_p5 }
  0x7d   : > { %621 = vmatmul.mubr.msk.f32.vlgmr.msra.gmra.mrb[0].mxu0 %vm232_vm0, %v225_v6 }
 0x14b   : > { %v467_v7 = vpop.f32.mrb[0].mxu1 }
 0x14c   : > { %v472_v8 = vrot.slane %v467_v7, 4  ;;  %v478_v9 = vmul.f32 %v467_v7, %v467_v7  ;;  %v627_v10 = vpop.f32.mrb[1].mxu1 }
 0x14e   : > { %v473_v11 = vadd.f32 %v472_v8, %v467_v7  ;;  %v479_v12 = vrot.slane %v478_v9, 4 }
 0x150   : > { %v480_v13 = vadd.f32 %v479_v12, %v478_v9  ;;  %v375_v14 = vpop.f32.mrb[0].mxu0  ;;  %v474_v18 = vrot.slane %v473_v11, 2 }
 0x151   : > { %v387_v15 = vrot.slane %v375_v14, 4  ;;  %v393_v16 = vmul.f32 %v375_v14, %v375_v14  ;;  %v622_v17 = vpop.f32.mrb[1].mxu0 }
 0x152   : > { %v481_v19 = vrot.slane %v480_v13, 2  ;;  %v475_v24 = vadd.f32 %v474_v18, %v473_v11 }
 0x153   : > { %v388_v20 = vadd.f32 %v387_v15, %v375_v14  ;;  %v394_v21 = vrot.slane %v393_v16, 4 }
 0x154   : > { %v482_v25 = vadd.f32 %v481_v19, %v480_v13  ;;  %v476_v30 = vrot.slane %v475_v24, 1 }
 0x155   : > { %v389_v22 = vrot.slane %v388_v20, 2  ;;  %v395_v23 = vadd.f32 %v394_v21, %v393_v16 }
 0x156   : > { %v483_v31 = vrot.slane %v482_v25, 1  ;;  %v477_v35 = vadd.f32 %v476_v30, %v475_v24 }
 0x157   : > { %v390_v26 = vadd.f32 %v389_v22, %v388_v20  ;;  %v396_v27 = vrot.slane %v395_v23, 2 }
 0x158   : > { %v484_v36 = vadd.f32 %v483_v31, %v482_v25 }
 0x159   : > { %v391_v28 = vrot.slane %v390_v26, 1  ;;  %v397_v29 = vadd.f32 %v396_v27, %v395_v23 }
 0x15b   : > { %v398_v32 = vrot.slane %v397_v29, 1  ;;  %v392_v33 = vadd.f32 %v391_v28, %v390_v26 }
 0x15d   : > { %v399_v34 = vadd.f32 %v398_v32, %v397_v29 }
 0x15f   : > { %v487_v38 = vsel %vm486_vm2, %v392_v33, %v399_v34 }
 0x160   : > { %v489_v39 = vsel %vm488_vm3, %v487_v38, %v477_v35 }
 0x161   : > { %v491_v40 = vsel %vm490_vm4, %v489_v39, %v484_v36 }
 0x162   : > { %v492_v41 = vadd.f32 %v491_v40, %v485_v37 }
 0x164   : > { %493 = vst [vmem:[#allocation8] sm:$0xf] %v492_v41 }
 0x165   : > { %817 = shalt.err (!%p814_p13)
}
 0x166   : > { %s818_s18 = scalar_lea.hbm %s1150_s3, 64 }
 0x167   : > { %p819_p2 = scmp.ne.s32.totalorder %s1150_s3, %s818_s18  ;;  %p824_p0 = scmp.lt.u32.totalorder %s818_s18, %s1150_s3 }
 0x169   : > { %p820_p3 = pnand %p819_p2, %p1103_p9 }
 0x16b   : > { %p821_p12 = pneg %p820_p3 }
 0x16d   : > { %p826_p6 = pnand %p824_p0, %p821_p12 }
 0x16f   : > { %829 = shalt.err (!%p826_p6)
}
 0x170   : > { %641 = dma.vmem_to_hbm [thread:$0]  (%p1103_p9), %s502_s19, 64, %s1150_s3, [#allocation4]  }
 0x171   : > { %863 = dma.done.wait (%p1103_p9), [#allocation4], 64  }
 0x172   : > { %865 = vsyncadd (%p1103_p9), [#allocation4], 4294967232 }
 0x173 PF: > { %s18_s17 = sadd.s32 1, %s888_s17   ;;  %s1164_s12 = smov %s872_s13 }
 0x174   : > { %p15_p7 = scmp.ge.s32.totalorder %s18_s17, 4   ;;  %s1165_s13 = smov %s876_s14 }
 0x175   : > { %s1166_s14 = smov %s1040_s22  ;;  %s1167_s15 = smov %s884_s16 }
 0x176   : > { %s1168_s16 = smov %s1170_s6  ;;  %17 = sbr.rel (!%p15_p7) target bundleno = 6 (0x6), region = 84 }
 0x17d   :  { %514 = vsyncpa [#allocation3], 1 }
 0x17e   :  { %516 = vsyncpa [#allocation3 + $0x1], 1 }
 0x17f   :  { %517 = vsyncpa [#allocation6], 1 }
 0x180   :  { %518 = vsyncpa [#allocation4], 1 }
 0x181   :  { %520 = vsyncpa [#allocation4 + $0x1], 1 }

</bundles_post_ra>
